<compile_context>
chip_gen: v5e
topology: v5e:2x2
jax: 0.10.0
libtpu: 0.0.40
codegen_flags: <defaults>
</compile_context>

<pallas_src>
import functools

import numpy as np
import jax
import jax.numpy as jnp
from jax.experimental import pallas as pl
from jax.experimental.pallas import tpu as pltpu


def _build_layer_schedule(n_layers, non_linear, transpose):
    layers = []
    for i in range(n_layers):
        layers.append(("flex", i))
        if non_linear and i < n_layers - 1:
            layers.append(("act", i))
    if transpose:
        layers = list(reversed(layers))
    return layers


def _dgmrf_kernel(x_ref, adj_ref, a1dg_ref, a2dgm1_ref,   # VMEM
                  bias_ref, actw_ref,                     # SMEM scalars
                  o_ref,
                  *, n_layers, non_linear, transpose, with_bias):
    x = x_ref[...]                # [TB, N] f32 (one batch tile)
    adj = adj_ref[...]            # [N, N] bf16: A^T (forward) or A (transpose)

    schedule = _build_layer_schedule(n_layers, non_linear, transpose)

    for kind, i in schedule:
        if kind == "flex":
            a1dg = a1dg_ref[pl.ds(i, 1), :]       # [1, N] = alpha1 * deg**gamma
            a2dgm1 = a2dgm1_ref[pl.ds(i, 1), :]   # [1, N] = alpha2 * deg**(gamma-1)
            if transpose:
                # G^T x = a1 D^g x + (a2 D^(g-1) x) A
                lhs = (a2dgm1 * x).astype(jnp.bfloat16)
                agg = jnp.dot(lhs, adj, preferred_element_type=jnp.float32)
            else:
                # G x   = a1 D^g x + a2 D^(g-1) (x A^T)
                agg = a2dgm1 * jnp.dot(x.astype(jnp.bfloat16), adj,
                                       preferred_element_type=jnp.float32)
            x = a1dg * x + agg
            if with_bias:
                x = x + bias_ref[i]
        else:  # activation: prelu with weight softplus(w) (precomputed host-side)
            w = actw_ref[i]
            x = jnp.maximum(x, 0.0) + w * jnp.minimum(x, 0.0)

    o_ref[...] = x


@functools.partial(jax.jit,
                   static_argnames=("non_linear", "transpose", "with_bias", "tb"))
def dgmrf_forward(x, adj, degrees, alpha1, alpha2, bias, actw_raw, gammas,
                  *, non_linear=True, transpose=False, with_bias=True, tb=128):
    """Runs the full multi-layer DGMRF forward inside one Pallas kernel."""
    x = x.astype(jnp.float32)
    n_layers = int(alpha1.shape[0])
    B, N = x.shape

    # Pad batch to a multiple of the batch tile so matmul M >= 128 (MXU rows).
    nb = max(1, -(-B // tb))
    Bp = nb * tb
    if Bp != B:
        x = jnp.pad(x, ((0, Bp - B), (0, 0)))

    # Host-side parameter folding (plain JAX, tiny arrays, fused under jit):
    #   a1dg   = alpha1 * deg**gamma          [n_layers, N]
    #   a2dgm1 = alpha2 * deg**(gamma - 1)    [n_layers, N]
    # Clamp zero-degree nodes so deg**(gamma-1) cannot produce inf/NaN.
    deg = jnp.where(degrees > 0, degrees, 1.0).astype(jnp.float32)
    dg = deg[None, :] ** gammas[:, None]
    dgm1 = deg[None, :] ** (gammas[:, None] - 1.0)
    a1dg = (alpha1[:, None].astype(jnp.float32) * dg).astype(jnp.float32)
    a2dgm1 = (alpha2[:, None].astype(jnp.float32) * dgm1).astype(jnp.float32)
    act_w = jax.nn.softplus(actw_raw).astype(jnp.float32)   # [n_layers]

    # Only the orientation actually used (static `transpose`) is transferred.
    # 0/1 adjacency is exact in bf16 -> native-rate MXU operand.
    adj_rhs = (adj if transpose else adj.T).astype(jnp.bfloat16)

    kernel = functools.partial(
        _dgmrf_kernel,
        n_layers=n_layers, non_linear=non_linear,
        transpose=transpose, with_bias=with_bias)

    smem = pl.BlockSpec(memory_space=pltpu.MemorySpace.SMEM)

    flops = 2 * Bp * N * N * n_layers
    bytes_accessed = (N * N * 2                   # bf16 adjacency
                      + 2 * Bp * N * 4            # x in + out (f32)
                      + 2 * n_layers * N * 4      # folded per-layer vectors
                      + 2 * n_layers * 4)         # bias + act weights

    out = pl.pallas_call(
        kernel,
        out_shape=jax.ShapeDtypeStruct((Bp, N), jnp.float32),
        grid=(nb,),
        in_specs=[
            pl.BlockSpec((tb, N), lambda b: (b, 0)),           # x batch tile
            pl.BlockSpec((N, N), lambda b: (0, 0)),            # adjacency (resident)
            pl.BlockSpec((n_layers, N), lambda b: (0, 0)),     # a1dg (resident)
            pl.BlockSpec((n_layers, N), lambda b: (0, 0)),     # a2dgm1 (resident)
            smem,                                              # bias
            smem,                                              # act weights
        ],
        out_specs=pl.BlockSpec((tb, N), lambda b: (b, 0)),
        compiler_params=pltpu.CompilerParams(
            dimension_semantics=("parallel",)),
        cost_estimate=pl.CostEstimate(flops=flops, transcendentals=0,
                                      bytes_accessed=bytes_accessed),
    )(x, adj_rhs, a1dg, a2dgm1, bias.astype(jnp.float32), act_w)

    return out[:B]


def dgmrf_ref(x, adj, degrees, alpha1, alpha2, bias, actw_raw, gammas,
              *, non_linear=True, transpose=False, with_bias=True):
    """Pure-JAX f32 reference with identical semantics."""
    n_layers = int(alpha1.shape[0])
    schedule = _build_layer_schedule(n_layers, non_linear, transpose)
    x = x.astype(jnp.float32)
    adj = adj.astype(jnp.float32)
    deg = jnp.where(degrees > 0, degrees, 1.0).astype(jnp.float32)
    for kind, i in schedule:
        if kind == "flex":
            dg = deg ** gammas[i]
            dgm1 = deg ** (gammas[i] - 1.0)
            if transpose:
                agg = (dgm1[None, :] * x) @ adj
            else:
                agg = (x @ adj.T) * dgm1[None, :]
            x = alpha1[i] * (dg[None, :] * x) + alpha2[i] * agg
            if with_bias:
                x = x + bias[i]
        else:
            w = jax.nn.softplus(actw_raw[i])
            x = jnp.maximum(x, 0.0) + w * jnp.minimum(x, 0.0)
    return x


def _grid_graph_adjacency(h, w):
    n = h * w
    a = np.zeros((n, n), np.float32)
    for r in range(h):
        for c in range(w):
            i = r * w + c
            for dr, dc in ((1, 0), (-1, 0), (0, 1), (0, -1)):
                rr, cc = r + dr, c + dc
                if 0 <= rr < h and 0 <= cc < w:
                    a[i, rr * w + cc] = 1.0
    return a


if __name__ == "__main__":
    # Synthetic problem: 8x16 lattice graph -> N=128 nodes, batch B=256 samples
    # (two 128-row MXU tiles; the batch-tile grid axis is "parallel").
    H, W, B = 8, 16, 256
    N = H * W
    n_layers = 3

    adj_np = _grid_graph_adjacency(H, W)
    adj = jnp.asarray(adj_np)
    degrees = jnp.asarray(adj_np.sum(axis=1))

    # Deterministic parameters (shapes implied by the module: one scalar
    # alpha1/alpha2/bias/gamma per FlexLayer, one weight per activation).
    alpha1 = jnp.array([0.9, 0.8, 0.7], jnp.float32)
    alpha2 = jnp.array([0.30, -0.25, 0.20], jnp.float32)
    bias = jnp.array([0.10, -0.05, 0.02], jnp.float32)
    actw_raw = jnp.array([0.20, -0.30, 0.00], jnp.float32)
    gammas = jnp.array([1.0, 0.7, 0.5], jnp.float32)

    key = jax.random.PRNGKey(0)
    x = jax.random.normal(key, (B, N), dtype=jnp.float32)

    ok = True
    for transpose in (False, True):
        out = dgmrf_forward(x, adj, degrees, alpha1, alpha2, bias, actw_raw,
                            gammas, non_linear=True, transpose=transpose,
                            with_bias=True)
        out = jax.block_until_ready(out)
        ref = dgmrf_ref(x, adj, degrees, alpha1, alpha2, bias, actw_raw,
                        gammas, non_linear=True, transpose=transpose,
                        with_bias=True)
        # bf16 MXU operands (f32 accumulate) -> compare with loosened tolerance.
        rel = float(jnp.max(jnp.abs(out - ref)) /
                    (jnp.max(jnp.abs(ref)) + 1e-6))
        ok = ok and (rel < 2e-2)

    if ok:
        print("KERNEL_OK")
    else:
        print("MISMATCH")
</pallas_src>

<mosaic_0001>
module attributes {stable_mosaic.version = 11 : i64} {
  func.func @_dgmrf_kernel(%arg0: i32, %arg1: memref<128x128xf32, #tpu.memory_space<vmem>>, %arg2: memref<128x128xbf16, #tpu.memory_space<vmem>>, %arg3: memref<3x128xf32, #tpu.memory_space<vmem>>, %arg4: memref<3x128xf32, #tpu.memory_space<vmem>>, %arg5: memref<3xf32, #tpu.memory_space<smem>>, %arg6: memref<3xf32, #tpu.memory_space<smem>>, %arg7: memref<128x128xf32, #tpu.memory_space<vmem>>) attributes {dimension_semantics = [#tpu.dimension_semantics<parallel>], iteration_bounds = array<i64: 2>, scalar_prefetch = 0 : i64, scratch_operands = 0 : i64, tpu.core_type = #tpu.core_type<tc>, window_params = [{transform_indices = @transform_0, window_bounds = array<i64: 128, 128>}, {pipeline_mode = #tpu.pipeline_mode<synchronous>, transform_indices = @transform_1, window_bounds = array<i64: 128, 128>}, {pipeline_mode = #tpu.pipeline_mode<synchronous>, transform_indices = @transform_2, window_bounds = array<i64: 3, 128>}, {pipeline_mode = #tpu.pipeline_mode<synchronous>, transform_indices = @transform_3, window_bounds = array<i64: 3, 128>}, {transform_indices = @transform_4, window_bounds = array<i64: 3>}, {transform_indices = @transform_5, window_bounds = array<i64: 3>}, {transform_indices = @transform_6, window_bounds = array<i64: 128, 128>}]} {
    %c0 = arith.constant 0 : index
    %c0_0 = arith.constant 0 : index
    %0 = vector.load %arg1[%c0, %c0_0] : memref<128x128xf32, #tpu.memory_space<vmem>>, vector<128x128xf32>
    %c0_1 = arith.constant 0 : index
    %c0_2 = arith.constant 0 : index
    %1 = vector.load %arg2[%c0_1, %c0_2] : memref<128x128xbf16, #tpu.memory_space<vmem>>, vector<128x128xbf16>
    %c0_3 = arith.constant 0 : index
    %c0_4 = arith.constant 0 : index
    %2 = vector.load %arg3[%c0_3, %c0_4] : memref<3x128xf32, #tpu.memory_space<vmem>>, vector<1x128xf32>
    %c0_5 = arith.constant 0 : index
    %c0_6 = arith.constant 0 : index
    %3 = vector.load %arg4[%c0_5, %c0_6] : memref<3x128xf32, #tpu.memory_space<vmem>>, vector<1x128xf32>
    %4 = arith.truncf %0 : vector<128x128xf32> to vector<128x128xbf16>
    %cst = arith.constant dense<0.000000e+00> : vector<128x128xf32>
    %5 = tpu.matmul %4, %1, %cst {dimension_numbers = #tpu.dot_dimension_numbers<[1], [0], [0], [1], [0, 0, 1, 1], [], []>} : vector<128x128xbf16>, vector<128x128xbf16>, vector<128x128xf32> -> vector<128x128xf32>
    %6 = vector.broadcast %3 : vector<1x128xf32> to vector<128x128xf32>
    %7 = arith.mulf %6, %5 : vector<128x128xf32>
    %8 = vector.broadcast %2 : vector<1x128xf32> to vector<128x128xf32>
    %9 = arith.mulf %8, %0 : vector<128x128xf32>
    %10 = arith.addf %9, %7 : vector<128x128xf32>
    %c0_7 = arith.constant 0 : index
    %11 = memref.load %arg5[%c0_7] : memref<3xf32, #tpu.memory_space<smem>>
    %12 = vector.broadcast %11 : f32 to vector<128x128xf32>
    %13 = arith.addf %10, %12 : vector<128x128xf32>
    %c0_8 = arith.constant 0 : index
    %14 = memref.load %arg6[%c0_8] : memref<3xf32, #tpu.memory_space<smem>>
    %cst_9 = arith.constant 0.000000e+00 : f32
    %15 = vector.broadcast %cst_9 : f32 to vector<128x128xf32>
    %16 = arith.maximumf %13, %15 : vector<128x128xf32>
    %cst_10 = arith.constant 0.000000e+00 : f32
    %17 = vector.broadcast %cst_10 : f32 to vector<128x128xf32>
    %18 = arith.minimumf %13, %17 : vector<128x128xf32>
    %19 = vector.broadcast %14 : f32 to vector<128x128xf32>
    %20 = arith.mulf %19, %18 : vector<128x128xf32>
    %21 = arith.addf %16, %20 : vector<128x128xf32>
    %c1 = arith.constant 1 : index
    %c0_11 = arith.constant 0 : index
    %22 = vector.load %arg3[%c1, %c0_11] : memref<3x128xf32, #tpu.memory_space<vmem>>, vector<1x128xf32>
    %c1_12 = arith.constant 1 : index
    %c0_13 = arith.constant 0 : index
    %23 = vector.load %arg4[%c1_12, %c0_13] : memref<3x128xf32, #tpu.memory_space<vmem>>, vector<1x128xf32>
    %24 = arith.truncf %21 : vector<128x128xf32> to vector<128x128xbf16>
    %cst_14 = arith.constant dense<0.000000e+00> : vector<128x128xf32>
    %25 = tpu.matmul %24, %1, %cst_14 {dimension_numbers = #tpu.dot_dimension_numbers<[1], [0], [0], [1], [0, 0, 1, 1], [], []>} : vector<128x128xbf16>, vector<128x128xbf16>, vector<128x128xf32> -> vector<128x128xf32>
    %26 = vector.broadcast %23 : vector<1x128xf32> to vector<128x128xf32>
    %27 = arith.mulf %26, %25 : vector<128x128xf32>
    %28 = vector.broadcast %22 : vector<1x128xf32> to vector<128x128xf32>
    %29 = arith.mulf %28, %21 : vector<128x128xf32>
    %30 = arith.addf %29, %27 : vector<128x128xf32>
    %c1_15 = arith.constant 1 : index
    %31 = memref.load %arg5[%c1_15] : memref<3xf32, #tpu.memory_space<smem>>
    %32 = vector.broadcast %31 : f32 to vector<128x128xf32>
    %33 = arith.addf %30, %32 : vector<128x128xf32>
    %c1_16 = arith.constant 1 : index
    %34 = memref.load %arg6[%c1_16] : memref<3xf32, #tpu.memory_space<smem>>
    %cst_17 = arith.constant 0.000000e+00 : f32
    %35 = vector.broadcast %cst_17 : f32 to vector<128x128xf32>
    %36 = arith.maximumf %33, %35 : vector<128x128xf32>
    %cst_18 = arith.constant 0.000000e+00 : f32
    %37 = vector.broadcast %cst_18 : f32 to vector<128x128xf32>
    %38 = arith.minimumf %33, %37 : vector<128x128xf32>
    %39 = vector.broadcast %34 : f32 to vector<128x128xf32>
    %40 = arith.mulf %39, %38 : vector<128x128xf32>
    %41 = arith.addf %36, %40 : vector<128x128xf32>
    %c2 = arith.constant 2 : index
    %c0_19 = arith.constant 0 : index
    %42 = vector.load %arg3[%c2, %c0_19] : memref<3x128xf32, #tpu.memory_space<vmem>>, vector<1x128xf32>
    %c2_20 = arith.constant 2 : index
    %c0_21 = arith.constant 0 : index
    %43 = vector.load %arg4[%c2_20, %c0_21] : memref<3x128xf32, #tpu.memory_space<vmem>>, vector<1x128xf32>
    %44 = arith.truncf %41 : vector<128x128xf32> to vector<128x128xbf16>
    %cst_22 = arith.constant dense<0.000000e+00> : vector<128x128xf32>
    %45 = tpu.matmul %44, %1, %cst_22 {dimension_numbers = #tpu.dot_dimension_numbers<[1], [0], [0], [1], [0, 0, 1, 1], [], []>} : vector<128x128xbf16>, vector<128x128xbf16>, vector<128x128xf32> -> vector<128x128xf32>
    %46 = vector.broadcast %43 : vector<1x128xf32> to vector<128x128xf32>
    %47 = arith.mulf %46, %45 : vector<128x128xf32>
    %48 = vector.broadcast %42 : vector<1x128xf32> to vector<128x128xf32>
    %49 = arith.mulf %48, %41 : vector<128x128xf32>
    %50 = arith.addf %49, %47 : vector<128x128xf32>
    %c2_23 = arith.constant 2 : index
    %51 = memref.load %arg5[%c2_23] : memref<3xf32, #tpu.memory_space<smem>>
    %52 = vector.broadcast %51 : f32 to vector<128x128xf32>
    %53 = arith.addf %50, %52 : vector<128x128xf32>
    %c0_24 = arith.constant 0 : index
    %c0_25 = arith.constant 0 : index
    %54 = vector.load %arg7[%c0_24, %c0_25] : memref<128x128xf32, #tpu.memory_space<vmem>>, vector<128x128xf32>
    tpu.vector_store %arg7[%c0_24, %c0_25], %53 {strides = array<i32>} : memref<128x128xf32, #tpu.memory_space<vmem>>, vector<128x128xf32>,
    return
  }
  func.func @transform_0(%arg0: i32) -> (i32, i32) {
    %c0_i32 = arith.constant 0 : i32
    %c0_i32_0 = arith.constant 0 : i32
    return %arg0, %c0_i32 : i32, i32
  }
  func.func @transform_1(%arg0: i32) -> (i32, i32) {
    %c0_i32 = arith.constant 0 : i32
    %c0_i32_0 = arith.constant 0 : i32
    %c0_i32_1 = arith.constant 0 : i32
    return %c0_i32, %c0_i32_0 : i32, i32
  }
  func.func @transform_2(%arg0: i32) -> (i32, i32) {
    %c0_i32 = arith.constant 0 : i32
    %c0_i32_0 = arith.constant 0 : i32
    %c0_i32_1 = arith.constant 0 : i32
    return %c0_i32, %c0_i32_0 : i32, i32
  }
  func.func @transform_3(%arg0: i32) -> (i32, i32) {
    %c0_i32 = arith.constant 0 : i32
    %c0_i32_0 = arith.constant 0 : i32
    %c0_i32_1 = arith.constant 0 : i32
    return %c0_i32, %c0_i32_0 : i32, i32
  }
  func.func @transform_4(%arg0: i32) -> i32 {
    %c0_i32 = arith.constant 0 : i32
    %c0_i32_0 = arith.constant 0 : i32
    return %c0_i32 : i32
  }
  func.func @transform_5(%arg0: i32) -> i32 {
    %c0_i32 = arith.constant 0 : i32
    %c0_i32_0 = arith.constant 0 : i32
    return %c0_i32 : i32
  }
  func.func @transform_6(%arg0: i32) -> (i32, i32) {
    %c0_i32 = arith.constant 0 : i32
    %c0_i32_0 = arith.constant 0 : i32
    return %arg0, %c0_i32 : i32, i32
  }
}

</mosaic_0001>

<bundles_post_ra>
// kernel: dgmrf_forward.1
= control target key start
LH: loop header
LB: loop body
LE: loop exit
PB: predicated region body
PF: predicated region fallthrough
CT: control target
= control target key end

     0   :  { %s1996_s0 = inlined_call_operand.hbm [shape: f32[256,128], index: 0, kind: input, shape index: {}]   ;;  %s1997_s1 = inlined_call_operand.vmem [shape: bf16[128,128], index: 1, kind: input, shape index: {}]   ;;  %s1998_s2 = inlined_call_operand.vmem [shape: f32[3,128], index: 2, kind: input, shape index: {}]   ;;  %s1999_s3 = inlined_call_operand.vmem [shape: f32[3,128], index: 3, kind: input, shape index: {}]   ;;  %s2000_s4 = inlined_call_operand.vmem [shape: f32[3], index: 4, kind: input, shape index: {}]   ;;  %s2001_s5 = inlined_call_operand.vmem [shape: f32[3], index: 5, kind: input, shape index: {}]   ;;  %s2002_s6 = inlined_call_operand.hbm [shape: f32[256,128], index: 6, kind: output, shape index: {}]  }
   0x1   :  { %2005 = sst [smem:[#allocation16_spill]] %s2000_s4 }
   0x2   :  { %2006 = sst [smem:[#allocation17_spill]] %s2001_s5 }
   0x3   :  { %11 = vsyncpa [#allocation3], 0 }
   0x4   :  { %13 = vsyncpa [#allocation3 + $0x1], 0 }
   0x5   :  { %14 = vsyncpa [#allocation5], 0 }
   0x6   :  { %15 = vsyncpa [#allocation8], 0 }
   0x7   :  { %16 = vsyncpa [#allocation4], 0 }
   0x8   :  { %18 = vsyncpa [#allocation4 + $0x1], 0  ;;  %s1362_s21 = smov 0   ;;  %s1364_s22 = smov 0  }
   0x9   :  { %s1366_s23 = smov 0   ;;  %s1368_s24 = smov 0  }
   0xa LB: > { %s1383_s25 = sadd.s32 4294967295, %s1319_s24   ;;  %s1021_s26 = sadd.s32 4294967294, %s1319_s24   ;;  %s1319_s24 = sphi %s1368_s24, %s2018_s24   ;;  %s1315_s23 = sphi %s1366_s23, %s2022_s23   ;;  %s1311_s22 = sphi %s1364_s22, %s2021_s22   ;;  %s1307_s21 = sphi %s1362_s21, %s2020_s21  }
   0xb   : > { %s1387_s27 = sadd.s32 1, %s1319_s24   ;;  %s31_s28 = sadd.s32 1, %s1315_s23 }
   0xc   : > { %2007 = sst [smem:[#allocation14_spill]] %s1387_s27  ;;  %s28_s29 = ssub.s32 %s1319_s24, %s1387_s27 }
   0xd   : > { %p38_p0 = scmp.ne.s32.totalorder %s1315_s23, %s1311_s22  ;;  %p29_p1 = scmp.eq.s32.totalorder %s28_s29, 0 }
   0xe   : > { %p39_p2 = scmp.eq.s32.totalorder %s1319_s24, 0  ;;  %p44_p3 = scmp.ne.s32.totalorder %s1311_s22, %s1307_s21 }
   0xf   : > { %p45_p4 = scmp.eq.s32.totalorder %s1383_s25, 0  ;;  %p173_p7 = scmp.eq.s32.totalorder %s1383_s25, 1 }
  0x10   : > { %s1399_s30 = scalar_select %p29_p1, %s1315_s23, %s31_s28  }
  0x11   : > { %p1401_p5 = por %p39_p2, %p38_p0  ;;  %p1407_p6 = por %p45_p4, %p44_p3 }
  0x12   : > { %2008 = sst [smem:[#allocation15_spill]] %s1399_s30  ;;  %p179_p8 = scmp.eq.s32.totalorder %s1021_s26, 1 }
  0x13   : > { %p1022_p9 = scmp.ge.s32.totalorder %s1319_s24, 1  ;;  %p186_p10 = scmp.lt.s32.totalorder %s1319_s24, 3 }
  0x14   : > { %p1414_p11 = por %p173_p7, %p38_p0  ;;  %p1418_p12 = por %p179_p8, %p44_p3 }
  0x15   : > { %p1422_p13 = pnand %p1022_p9, %p186_p10  ;;  %s2014_s4 = sld [smem:[#allocation16_spill]] }
  0x16   : > { %p1137_p2 = scmp.lt.s32.totalorder %s1319_s24, 2  ;;  %s2015_s5 = sld [smem:[#allocation17_spill]] }
  0x17   : > { %p1120_p1 = pneg %p1422_p13  ;;  %s1321_s19 = smov [#allocation6]  }
  0x18   : > { %p1440_p7 = pnand %p1137_p2, %p1401_p5  ;;  %s228_s20 = sand.u32 1, %s1315_s23  }
  0x19   : > { %p1121_p3 = pnand %p1120_p1, %p45_p4  ;;  %s1322_s26 = smov [#allocation7]  }
  0x1a   : > { %s1026_s28 = sshll.u32 %s228_s20, 7  ;;  %s1074_s29 = sshll.u32 %s1319_s24, 7 }
  0x1b   : > { %s207_s14 = sshll.u32 %s2014_s4, 4  ;;  %s237_s4 = scalar_lea.hbm %s1996_s0, %s1074_s29  ;;  %s208_s14 = int_to_ptr.vmem [resolvable:$true] %s207_s14 }
  0x1c   : > { %s217_s17 = sshll.u32 %s2015_s5, 4  ;;  %s232_s15 = scalar_lea.vmem [#allocation2], %s1026_s28  ;;  %s218_s17 = int_to_ptr.vmem [resolvable:$true] %s217_s17 }
  0x1d   : > { %1123 = dma.vmem_to_smem (!%p1121_p3), %s208_s14, 16, %s1321_s19, [#allocation5]  }
  0x1e   : > { %1126 = dma.vmem_to_smem (!%p1121_p3), %s218_s17, 16, %s1322_s26, [#allocation8]  }
  0x1f   : > { %s240_s16 = sshll.u32 %s232_s15, 4  ;;  %s238_s7 = sshll.u32 %s237_s4, 4  ;;  %s241_s16 = int_to_ptr.vmem [resolvable:$true] %s240_s16  ;;  %s239_s7 = int_to_ptr.hbm [resolvable:$true] %s238_s7 }
  0x20   : > { %s229_s5 = scalar_lea.sflag [#allocation3], %s228_s20  ;;  %s1215_s30 = sshra.s32 %s239_s7, 4  ;;  %s1216_s30 = int_to_ptr.hbm [resolvable:$true] %s1215_s30 }
  0x21   : > { %s1217_s27 = scalar_lea.hbm %s1216_s30, 128  ;;  %p1219_p8 = pneg %p1440_p7 }
  0x22   : > { %p1218_p5 = scmp.ne.s32.totalorder %s1216_s30, %s1217_s27  ;;  %s1222_s19 = scalar_lea.hbm %s1996_s0, 256 }
  0x23   : > { %p1223_p1 = scmp.lt.s32.totalorder %s1216_s30, %s1996_s0  ;;  %p1224_p2 = scmp.lt.s32.totalorder %s1222_s19, %s1217_s27 }
  0x24   : > { %p1220_p9 = pnand %p1219_p8, %p1218_p5 }
  0x25   : > { %p1225_p3 = por %p1224_p2, %p1223_p1 }
  0x26   : > { %p1221_p10 = pneg %p1220_p9 }
  0x28   : > { %p1226_p0 = pnand %p1225_p3, %p1221_p10 }
  0x2a   : > { %1229 = shalt.err (!%p1226_p0)
}
  0x2b   : > { %s1323_s4 = smov 128   ;;  %s1324_s20 = smov 8  }
  0x2c   : > { %1130 = dma.hbm_to_vmem [thread:$0]  (!%p1440_p7), %s239_s7, 2048, %s241_s16, %s229_s5, %s1323_s4, %s1323_s4, %s1324_s20  }
  0x2d   : > { %252 = sbr.rel (%p1422_p13) target bundleno = 615 (0x267), region = 44  ;;  %s1462_s28 = sand.u32 (!%p1422_p13), 1, %s1311_s22  }
  0x2e   : > { %s1030_s30 = sshll.u32 (!%p1422_p13), %s1462_s28, 7  ;;  %s255_s27 = scalar_lea.sflag (!%p1422_p13), [#allocation3], %s1462_s28 }
  0x2f   : > { %s1468_s12 = scalar_lea.vmem (!%p1422_p13), [#allocation2], %s1030_s30 }
  0x32   : > { %1290 = dma.done.wait (%p1407_p6), %s255_s27, 2048  }
  0x33   : > { %1292 = vsyncadd (%p1407_p6), %s255_s27, 4294965248 }
  0x34   : > { %1294 = dma.done.wait (%p45_p4), [#allocation5], 16  }
  0x35   : > { %1296 = vsyncadd (%p45_p4), [#allocation5], 4294967280 }
  0x36   : > { %1298 = dma.done.wait (%p45_p4), [#allocation8], 16  }
  0x37   : > { %1300 = vsyncadd (%p45_p4), [#allocation8], 4294967280 }
  0x38   : > { %274 = sfence }
  0x39   : > { %v1485_v0 = vld [vmem:[%s1997_s1 + $0x38] sm:$0xff]  ;;  %v1492_v1 = vld [vmem:[%s1997_s1 + $0x30] sm:$0xff]  ;;  %v1499_v2 = vld [vmem:[%s1997_s1 + $0x28] sm:$0xff]  ;;  %s490_s8 = sld [smem:[#allocation6]]  ;;  %s1884_s5 = scalar_lea.vmem [#allocation9], %s1030_s30 }
  0x3a   : > { %391 = vmatpush.bf16.msra.mxu0 %v1485_v0  ;;  %1084 = vmatpush.bf16.msra.mxu3 %v1485_v0  ;;  %v1079_v3 = vld [vmem:[%s1997_s1 + $0x20] sm:$0xff]  ;;  %v1078_v4 = vld [vmem:[%s1997_s1 + $0x18] sm:$0xff]  ;;  %v1077_v5 = vld [vmem:[%s1997_s1 + $0x10] sm:$0xff]  ;;  %s1066_s15 = sld [smem:[#allocation6 + $0x1]]  ;;  %s1083_s30 = sshll.u32 %s1383_s25, 7 }
  0x3b   : > { %584 = vmatpush.bf16.msra.mxu1 %v1485_v0  ;;  %777 = vmatpush.bf16.msra.mxu2 %v1485_v0  ;;  %v1076_v6 = vld [vmem:[%s1997_s1 + $0x8] sm:$0xff]  ;;  %v1075_v7 = vld [vmem:[%s1997_s1] sm:$0xff]  ;;  %v303_v14 = vld [vmem:[%s1468_s12 + $0x10] sm:$0xff]  ;;  %s1067_s19 = sld [smem:[#allocation7 + $0x1]]  ;;  %s922_s18 = scalar_lea.hbm %s2002_s6, %s1083_s30 }
  0x3c   : > { %v301_v8 = vld [vmem:[%s1468_s12] sm:$0xff]  ;;  %v1526_v9 = vld [vmem:[%s1468_s12 + $0x8] sm:$0xff]  ;;  %v1539_v15 = vld [vmem:[%s1468_s12 + $0x18] sm:$0xff]  ;;  %s1068_s26 = sld [smem:[#allocation6 + $0x2]]  ;;  %s923_s13 = sshll.u32 %s1884_s5, 4  ;;  %s924_s13 = int_to_ptr.vmem [resolvable:$true] %s923_s13 }
  0x3d   : > { %v313_v10 = vld [vmem:[%s1468_s12 + $0x60] sm:$0xff]  ;;  %v1530_v11 = vld [vmem:[%s1468_s12 + $0x68] sm:$0xff]  ;;  %v335_v12 = vpack.c.bf16 %v1526_v9, %v301_v8  ;;  %v1542_v16 = vld [vmem:[%s1468_s12 + $0x70] sm:$0xff]  ;;  %v336_v18 = vpack.c.bf16 %v1539_v15, %v303_v14  ;;  %s911_s25 = scalar_lea.sflag [#allocation4], %s1462_s28  ;;  %s1265_s17 = scalar_lea.hbm %s2002_s6, 256 }
  0x3e   : > { %392 = vmatpush.bf16.msra.mxu0 %v1492_v1  ;;  %1085 = vmatpush.bf16.msra.mxu3 %v1492_v1  ;;  %v341_v13 = vpack.c.bf16 %v1530_v11, %v313_v10  ;;  %v1545_v17 = vld [vmem:[%s1468_s12 + $0x78] sm:$0xff]  ;;  %v1551_v20 = vld [vmem:[%s1468_s12 + $0x20] sm:$0xff]  ;;  %v1554_v21 = vld [vmem:[%s1468_s12 + $0x28] sm:$0xff] }
  0x3f   : > { %585 = vmatpush.bf16.msra.mxu1 %v1492_v1  ;;  %778 = vmatpush.bf16.msra.mxu2 %v1492_v1  ;;  %v342_v19 = vpack.c.bf16 %v1545_v17, %v1542_v16  ;;  %v337_v22 = vpack.c.bf16 %v1554_v21, %v1551_v20  ;;  %v1562_v23 = vld [vmem:[%s1468_s12 + $0x30] sm:$0xff]  ;;  %v1565_v24 = vld [vmem:[%s1468_s12 + $0x38] sm:$0xff]  ;;  %v1570_v26 = vld [vmem:[%s1468_s12 + $0x40] sm:$0xff]  ;;  %v1597_v38 = vstv %s490_s8 }
  0x40   : > { %v338_v25 = vpack.c.bf16 %v1565_v24, %v1562_v23  ;;  %v1573_v27 = vld [vmem:[%s1468_s12 + $0x48] sm:$0xff]  ;;  %v1578_v29 = vld [vmem:[%s1468_s12 + $0x50] sm:$0xff]  ;;  %v1581_v30 = vld [vmem:[%s1468_s12 + $0x58] sm:$0xff]  ;;  %s508_s12 = sld [smem:[#allocation7]] }
  0x41   : > { %v339_v28 = vpack.c.bf16 %v1573_v27, %v1570_v26  ;;  %v340_v31 = vpack.c.bf16 %v1581_v30, %v1578_v29  ;;  %v1588_v32 = vld [vmem:[%s1998_s2] ss:$0 sm:$0xff] }
  0x42   : > { %393 = vmatpush.bf16.msra.mxu0 %v1499_v2  ;;  %1086 = vmatpush.bf16.msra.mxu3 %v1499_v2  ;;  %v1593_v33 = vld [vmem:[%s1999_s3] ss:$0 sm:$0xff]  ;;  %v458_v34 = vmul.f32 %v1588_v32, %v301_v8  ;;  %v470_v39 = vmul.f32 %v1588_v32, %v313_v10  ;;  %v459_v42 = vmul.f32 %v1588_v32, %v1526_v9 }
  0x43   : > { %586 = vmatpush.bf16.msra.mxu1 %v1499_v2  ;;  %779 = vmatpush.bf16.msra.mxu2 %v1499_v2  ;;  %v471_v51 = vmul.f32 %v1588_v32, %v1530_v11  ;;  %v460_v55 = vmul.f32 %v1588_v32, %v303_v14 }
  0x46   : > { %394 = vmatpush.bf16.msra.mxu0 %v1079_v3  ;;  %1087 = vmatpush.bf16.msra.mxu3 %v1079_v3  ;;  %v1606_v50 = vstv %s508_s12  ;;  %s925_s12 = sshll.u32 %s922_s18, 4  ;;  %s926_s12 = int_to_ptr.hbm [resolvable:$true] %s925_s12 }
  0x47   : > { %587 = vmatpush.bf16.msra.mxu1 %v1079_v3  ;;  %780 = vmatpush.bf16.msra.mxu2 %v1079_v3 }
  0x4a   : > { %395 = vmatpush.bf16.msra.mxu0 %v1078_v4  ;;  %1088 = vmatpush.bf16.msra.mxu3 %v1078_v4 }
  0x4b   : > { %588 = vmatpush.bf16.msra.mxu1 %v1078_v4  ;;  %781 = vmatpush.bf16.msra.mxu2 %v1078_v4 }
  0x4e   : > { %396 = vmatpush.bf16.msra.mxu0 %v1077_v5  ;;  %1089 = vmatpush.bf16.msra.mxu3 %v1077_v5 }
  0x4f   : > { %589 = vmatpush.bf16.msra.mxu1 %v1077_v5  ;;  %782 = vmatpush.bf16.msra.mxu2 %v1077_v5 }
  0x52   : > { %397 = vmatpush.bf16.msra.mxu0 %v1076_v6  ;;  %1090 = vmatpush.bf16.msra.mxu3 %v1076_v6 }
  0x53   : > { %590 = vmatpush.bf16.msra.mxu1 %v1076_v6  ;;  %783 = vmatpush.bf16.msra.mxu2 %v1076_v6 }
  0x56   : > { %398 = vmatpush.bf16.msra.mxu0 %v1075_v7  ;;  %1091 = vmatpush.bf16.msra.mxu3 %v1075_v7 }
  0x57   : > { %591 = vmatpush.bf16.msra.mxu1 %v1075_v7  ;;  %784 = vmatpush.bf16.msra.mxu2 %v1075_v7 }
  0x59   : > { %399 = vmatmul.bf16.vlgmr.msra.gmra.mxu0 %v335_v12  ;;  %429 = vmatmul.bf16.vlgmr.msra.gmra.mxu3 %v341_v13  ;;  %v461_v13 = vmul.f32 %v1588_v32, %v1539_v15 }
  0x5a   : > { %1092 = vmatpush.bf16.msrb.mxu3 %v1485_v0 }
  0x5e   : > { %1093 = vmatpush.bf16.msrb.mxu3 %v1492_v1 }
  0x62   : > { %1094 = vmatpush.bf16.msrb.mxu3 %v1499_v2 }
  0x66   : > { %1095 = vmatpush.bf16.msrb.mxu3 %v1079_v3 }
  0x69   : > { %404 = vmatmul.bf16.gmra.mxu0 %v336_v18  ;;  %434 = vmatmul.bf16.gmra.mxu3 %v342_v19 }
  0x6a   : > { %1096 = vmatpush.bf16.msrb.mxu3 %v1078_v4 }
  0x6e   : > { %1097 = vmatpush.bf16.msrb.mxu3 %v1077_v5 }
  0x72   : > { %1098 = vmatpush.bf16.msrb.mxu3 %v1076_v6 }
  0x76   : > { %1099 = vmatpush.bf16.msrb.mxu3 %v1075_v7 }
  0x79   : > { %409 = vmatmul.bf16.gmra.mxu0 %v337_v22 }
  0x7a   : > { %1100 = vmatpush.bf16.msra.mxu3 %v1485_v0 }
  0x7e   : > { %1101 = vmatpush.bf16.msra.mxu3 %v1492_v1 }
  0x82   : > { %1102 = vmatpush.bf16.msra.mxu3 %v1499_v2 }
  0x86   : > { %1103 = vmatpush.bf16.msra.mxu3 %v1079_v3 }
  0x89   : > { %414 = vmatmul.bf16.gmra.mxu0 %v338_v25 }
  0x8a   : > { %1104 = vmatpush.bf16.msra.mxu3 %v1078_v4 }
  0x8e   : > { %1105 = vmatpush.bf16.msra.mxu3 %v1077_v5 }
  0x92   : > { %1106 = vmatpush.bf16.msra.mxu3 %v1076_v6 }
  0x96   : > { %1107 = vmatpush.bf16.msra.mxu3 %v1075_v7  ;;  %v472_v7 = vmul.f32 %v1588_v32, %v1542_v16 }
  0x99   : > { %419 = vmatmul.bf16.gmra.mxu0 %v339_v28 }
  0xa9   : > { %424 = vmatmul.bf16.gmra.mxu0 %v340_v31 }
  0xd6   : > { %v400_v35 = vpop.f32.mrf.mxu0 }
  0xd7   : > { %v441_v36 = vmul.f32 %v1593_v33, %v400_v35 }
  0xd9   : > { %v474_v37 = vadd.f32 %v458_v34, %v441_v36  ;;  %v473_v36 = vmul.f32 %v1588_v32, %v1545_v17 }
  0xdb   : > { %v492_v40 = vadd.f32 %v1597_v38, %v474_v37 }
  0xdc   : > { %v430_v41 = vpop.f32.mrf.mxu3 }
  0xdd   : > { %v453_v43 = vmul.f32 %v1593_v33, %v430_v41  ;;  %v525_v47 = vmin.f32 %v492_v40, 0.0  ;;  %v509_v60 = vmax.f32 %v492_v40, 0.0  ;;  %v462_v41 = vmul.f32 %v1588_v32, %v1551_v20 }
  0xde   : > { %v402_v44 = vpop.f32.mrf.mxu0 }
  0xdf   : > { %v486_v45 = vadd.f32 %v470_v39, %v453_v43  ;;  %v442_v46 = vmul.f32 %v1593_v33, %v402_v44  ;;  %v542_v54 = vmul.f32 %v1606_v50, %v525_v47 }
  0xe1   : > { %v504_v48 = vadd.f32 %v1597_v38, %v486_v45  ;;  %v475_v49 = vadd.f32 %v459_v42, %v442_v46  ;;  %v1616_v2 = vadd.f32 %v542_v54, %v509_v60 }
  0xe3   : > { %v493_v52 = vadd.f32 %v1597_v38, %v475_v49  ;;  %v537_v56 = vmin.f32 %v504_v48, 0.0  ;;  %v521_v1 = vmax.f32 %v504_v48, 0.0 }
  0xe4   : > { %v432_v53 = vpop.f32.mrf.mxu3 }
  0xe5   : > { %v526_v57 = vmin.f32 %v493_v52, 0.0  ;;  %v454_v58 = vmul.f32 %v1593_v33, %v432_v53  ;;  %v510_v63 = vmax.f32 %v493_v52, 0.0  ;;  %v554_v6 = vmul.f32 %v1606_v50, %v537_v56 }
  0xe6   : > { %v405_v59 = vpop.f32.mrf.mxu0 }
  0xe7   : > { %v487_v61 = vadd.f32 %v471_v51, %v454_v58  ;;  %v443_v62 = vmul.f32 %v1593_v33, %v405_v59  ;;  %v543_v0 = vmul.f32 %v1606_v50, %v526_v57  ;;  %v1631_v19 = vadd.f32 %v554_v6, %v521_v1 }
  0xe8   : > { %v463_v59 = vmul.f32 %v1588_v32, %v1554_v21  ;;  %v464_v21 = vmul.f32 %v1588_v32, %v1562_v23  ;;  %v465_v23 = vmul.f32 %v1588_v32, %v1565_v24 }
  0xe9   : > { %v505_v3 = vadd.f32 %v1597_v38, %v487_v61  ;;  %v476_v4 = vadd.f32 %v460_v55, %v443_v62  ;;  %v1619_v5 = vadd.f32 %v543_v0, %v510_v63 }
  0xeb   : > { %v522_v8 = vmax.f32 %v505_v3, 0.0  ;;  %v538_v9 = vmin.f32 %v505_v3, 0.0  ;;  %v576_v10 = vpack.c.bf16 %v1619_v5, %v1616_v2  ;;  %v494_v11 = vadd.f32 %v1597_v38, %v476_v4 }
  0xec   : > { %v435_v12 = vpop.f32.mrf.mxu3 }
  0xed   : > { %v455_v14 = vmul.f32 %v1593_v33, %v435_v12  ;;  %592 = vmatmul.bf16.vlgmr.msra.gmra.mxu1 %v576_v10  ;;  %v555_v18 = vmul.f32 %v1606_v50, %v538_v9  ;;  %v527_v31 = vmin.f32 %v494_v11, 0.0  ;;  %v511_v46 = vmax.f32 %v494_v11, 0.0 }
  0xee   : > { %v407_v22 = vpop.f32.mrf.mxu0 }
  0xef   : > { %v488_v16 = vadd.f32 %v472_v7, %v455_v14  ;;  %v444_v25 = vmul.f32 %v1593_v33, %v407_v22  ;;  %v1634_v28 = vadd.f32 %v555_v18, %v522_v8  ;;  %v544_v40 = vmul.f32 %v1606_v50, %v527_v31 }
  0xf1   : > { %v506_v34 = vadd.f32 %v1597_v38, %v488_v16  ;;  %v477_v35 = vadd.f32 %v461_v13, %v444_v25  ;;  %v582_v15 = vpack.c.bf16 %v1634_v28, %v1631_v19  ;;  %v1648_v51 = vadd.f32 %v544_v40, %v511_v46 }
  0xf3   : > { %v495_v37 = vadd.f32 %v1597_v38, %v477_v35  ;;  %622 = vmatmul.bf16.vlgmr.msrb.gmra.mxu3 %v582_v15  ;;  %v539_v42 = vmin.f32 %v506_v34, 0.0  ;;  %v523_v52 = vmax.f32 %v506_v34, 0.0 }
  0xf4   : > { %v437_v39 = vpop.f32.mrf.mxu3 }
  0xf5   : > { %v528_v43 = vmin.f32 %v495_v37, 0.0  ;;  %v456_v44 = vmul.f32 %v1593_v33, %v437_v39  ;;  %v512_v49 = vmax.f32 %v495_v37, 0.0  ;;  %v556_v20 = vmul.f32 %v1606_v50, %v539_v42 }
  0xf6   : > { %v410_v45 = vpop.f32.mrf.mxu0  ;;  %v466_v39 = vmul.f32 %v1588_v32, %v1570_v26  ;;  %v467_v26 = vmul.f32 %v1588_v32, %v1573_v27 }
  0xf7   : > { %v489_v47 = vadd.f32 %v473_v36, %v456_v44  ;;  %v445_v48 = vmul.f32 %v1593_v33, %v410_v45  ;;  %v545_v17 = vmul.f32 %v1606_v50, %v528_v43  ;;  %v1660_v62 = vadd.f32 %v556_v20, %v523_v52 }
  0xf9   : > { %v507_v53 = vadd.f32 %v1597_v38, %v489_v47  ;;  %v478_v54 = vadd.f32 %v462_v41, %v445_v48  ;;  %v1651_v55 = vadd.f32 %v545_v17, %v512_v49 }
  0xfb   : > { %v540_v56 = vmin.f32 %v507_v53, 0.0  ;;  %v577_v57 = vpack.c.bf16 %v1651_v55, %v1648_v51  ;;  %v524_v58 = vmax.f32 %v507_v53, 0.0  ;;  %v496_v60 = vadd.f32 %v1597_v38, %v478_v54 }
  0xfd   : > { %597 = vmatmul.bf16.gmra.mxu1 %v577_v57  ;;  %v557_v61 = vmul.f32 %v1606_v50, %v540_v56  ;;  %v529_v3 = vmin.f32 %v496_v60, 0.0  ;;  %v513_v12 = vmax.f32 %v496_v60, 0.0  ;;  %v468_v57 = vmul.f32 %v1588_v32, %v1578_v29 }
  0xfe   : > { %v412_v63 = vpop.f32.mrf.mxu0  ;;  %v469_v29 = vmul.f32 %v1588_v32, %v1581_v30 }
  0xff   : > { %v446_v0 = vmul.f32 %v1593_v33, %v412_v63  ;;  %v1663_v1 = vadd.f32 %v557_v61, %v524_v58  ;;  %v546_v9 = vmul.f32 %v1606_v50, %v529_v3 }
 0x101   : > { %v479_v4 = vadd.f32 %v463_v59, %v446_v0  ;;  %v583_v6 = vpack.c.bf16 %v1663_v1, %v1660_v62  ;;  %v1673_v22 = vadd.f32 %v546_v9, %v513_v12 }
 0x103   : > { %v497_v7 = vadd.f32 %v1597_v38, %v479_v4  ;;  %627 = vmatmul.bf16.gmra.mxu3 %v583_v6 }
 0x105   : > { %v530_v8 = vmin.f32 %v497_v7, 0.0  ;;  %v514_v13 = vmax.f32 %v497_v7, 0.0 }
 0x106   : > { %v415_v10 = vpop.f32.mrf.mxu0 }
 0x107   : > { %v447_v11 = vmul.f32 %v1593_v33, %v415_v10  ;;  %v547_v14 = vmul.f32 %v1606_v50, %v530_v8 }
 0x109   : > { %v480_v18 = vadd.f32 %v464_v21, %v447_v11  ;;  %v1675_v16 = vadd.f32 %v547_v14, %v514_v13 }
 0x10b   : > { %v578_v25 = vpack.c.bf16 %v1675_v16, %v1673_v22  ;;  %v498_v31 = vadd.f32 %v1597_v38, %v480_v18 }
 0x10d   : > { %602 = vmatmul.bf16.gmra.mxu1 %v578_v25  ;;  %v531_v15 = vmin.f32 %v498_v31, 0.0  ;;  %v515_v24 = vmax.f32 %v498_v31, 0.0 }
 0x10e   : > { %v417_v34 = vpop.f32.mrf.mxu0 }
 0x10f   : > { %v448_v35 = vmul.f32 %v1593_v33, %v417_v34  ;;  %v548_v41 = vmul.f32 %v1606_v50, %v531_v15 }
 0x111   : > { %v481_v36 = vadd.f32 %v465_v23, %v448_v35  ;;  %v1689_v47 = vadd.f32 %v548_v41, %v515_v24 }
 0x113   : > { %v499_v37 = vadd.f32 %v1597_v38, %v481_v36  ;;  %v1737_v36 = vstv %s1066_s15  ;;  %s1259_s15 = sshra.s32 %s926_s12, 4  ;;  %s1260_s15 = int_to_ptr.hbm [resolvable:$true] %s1259_s15 }
 0x114   : > { %s1261_s16 = scalar_lea.hbm %s1260_s15, 128  ;;  %p1266_p0 = scmp.lt.s32.totalorder %s1260_s15, %s2002_s6 }
 0x115   : > { %v532_v40 = vmin.f32 %v499_v37, 0.0  ;;  %v516_v44 = vmax.f32 %v499_v37, 0.0  ;;  %p1262_p4 = scmp.ne.s32.totalorder %s1260_s15, %s1261_s16  ;;  %p1267_p7 = scmp.lt.s32.totalorder %s1265_s17, %s1261_s16 }
 0x116   : > { %v420_v42 = vpop.f32.mrf.mxu0 }
 0x117   : > { %v449_v43 = vmul.f32 %v1593_v33, %v420_v42  ;;  %v549_v45 = vmul.f32 %v1606_v50, %v532_v40  ;;  %p1263_p6 = pnand %p1262_p4, %p1414_p11  ;;  %p1268_p5 = por %p1267_p7, %p1266_p0 }
 0x119   : > { %v482_v46 = vadd.f32 %v466_v39, %v449_v43  ;;  %v1691_v48 = vadd.f32 %v549_v45, %v516_v44  ;;  %v1743_v44 = vstv %s1067_s19  ;;  %p1264_p13 = pneg %p1263_p6 }
 0x11b   : > { %v579_v49 = vpack.c.bf16 %v1691_v48, %v1689_v47  ;;  %v500_v17 = vadd.f32 %v1597_v38, %v482_v46  ;;  %p1269_p8 = pnand %p1268_p5, %p1264_p13 }
 0x11d   : > { %607 = vmatmul.bf16.gmra.mxu1 %v579_v49  ;;  %v533_v54 = vmin.f32 %v500_v17, 0.0  ;;  %v517_v27 = vmax.f32 %v500_v17, 0.0 }
 0x11e   : > { %v422_v52 = vpop.f32.mrf.mxu0 }
 0x11f   : > { %v450_v53 = vmul.f32 %v1593_v33, %v422_v52  ;;  %v550_v59 = vmul.f32 %v1606_v50, %v533_v54 }
 0x121   : > { %v483_v20 = vadd.f32 %v467_v26, %v450_v53  ;;  %v1705_v4 = vadd.f32 %v550_v59, %v517_v27 }
 0x123   : > { %v501_v56 = vadd.f32 %v1597_v38, %v483_v20 }
 0x125   : > { %v534_v58 = vmin.f32 %v501_v56, 0.0  ;;  %v518_v63 = vmax.f32 %v501_v56, 0.0 }
 0x126   : > { %v425_v60 = vpop.f32.mrf.mxu0 }
 0x127   : > { %v451_v61 = vmul.f32 %v1593_v33, %v425_v60  ;;  %v551_v0 = vmul.f32 %v1606_v50, %v534_v58 }
 0x129   : > { %v484_v3 = vadd.f32 %v468_v57, %v451_v61  ;;  %v1707_v6 = vadd.f32 %v551_v0, %v518_v63 }
 0x12b   : > { %v580_v7 = vpack.c.bf16 %v1707_v6, %v1705_v4  ;;  %v502_v21 = vadd.f32 %v1597_v38, %v484_v3 }
 0x12d   : > { %612 = vmatmul.bf16.gmra.mxu1 %v580_v7  ;;  %v535_v10 = vmin.f32 %v502_v21, 0.0  ;;  %v519_v18 = vmax.f32 %v502_v21, 0.0 }
 0x12e   : > { %v427_v8 = vpop.f32.mrf.mxu0 }
 0x12f   : > { %v452_v9 = vmul.f32 %v1593_v33, %v427_v8  ;;  %v552_v14 = vmul.f32 %v1606_v50, %v535_v10  ;;  %v1727_v33 = vld [vmem:[%s1999_s3 + $0x1] ss:$0 sm:$0xff] }
 0x131   : > { %v485_v11 = vadd.f32 %v469_v29, %v452_v9  ;;  %v1718_v31 = vadd.f32 %v552_v14, %v519_v18 }
 0x133   : > { %v503_v12 = vadd.f32 %v1597_v38, %v485_v11  ;;  %v1732_v38 = vld [vmem:[%s1998_s2 + $0x1] ss:$0 sm:$0xff] }
 0x134   : > { %v651_v35 = vmul.f32 %v1732_v38, %v1616_v2  ;;  %v652_v41 = vmul.f32 %v1732_v38, %v1619_v5  ;;  %v663_v46 = vmul.f32 %v1732_v38, %v1631_v19  ;;  %v653_v5 = vmul.f32 %v1732_v38, %v1648_v51 }
 0x135   : > { %v536_v13 = vmin.f32 %v503_v12, 0.0  ;;  %v520_v25 = vmax.f32 %v503_v12, 0.0  ;;  %v664_v27 = vmul.f32 %v1732_v38, %v1634_v28  ;;  %v654_v8 = vmul.f32 %v1732_v38, %v1651_v55 }
 0x136   : > { %v665_v14 = vmul.f32 %v1732_v38, %v1660_v62 }
 0x137   : > { %v553_v23 = vmul.f32 %v1606_v50, %v536_v13 }
 0x139   : > { %v1720_v30 = vadd.f32 %v553_v23, %v520_v25 }
 0x13b   : > { %v581_v32 = vpack.c.bf16 %v1720_v30, %v1718_v31 }
 0x13d   : > { %617 = vmatmul.bf16.gmra.mxu1 %v581_v32 }
 0x16a   : > { %v593_v50 = vpop.f32.mrf.mxu1 }
 0x16b   : > { %v634_v34 = vmul.f32 %v1727_v33, %v593_v50 }
 0x16d   : > { %v667_v15 = vadd.f32 %v651_v35, %v634_v34 }
 0x16f   : > { %v685_v37 = vadd.f32 %v1737_v36, %v667_v15 }
 0x171   : > { %v718_v42 = vmin.f32 %v685_v37, 0.0  ;;  %v702_v54 = vmax.f32 %v685_v37, 0.0 }
 0x172   : > { %v595_v39 = vpop.f32.mrf.mxu1 }
 0x173   : > { %v635_v40 = vmul.f32 %v1727_v33, %v595_v39  ;;  %v735_v17 = vmul.f32 %v1743_v44, %v718_v42  ;;  %v655_v39 = vmul.f32 %v1732_v38, %v1673_v22 }
 0x175   : > { %v668_v43 = vadd.f32 %v652_v41, %v635_v40  ;;  %v1755_v59 = vadd.f32 %v735_v17, %v702_v54 }
 0x176   : > { %v623_v24 = vpop.f32.mrf.mxu3 }
 0x177   : > { %v686_v45 = vadd.f32 %v1737_v36, %v668_v43  ;;  %v646_v2 = vmul.f32 %v1727_v33, %v623_v24 }
 0x179   : > { %v719_v49 = vmin.f32 %v686_v45, 0.0  ;;  %v679_v26 = vadd.f32 %v663_v46, %v646_v2  ;;  %v703_v20 = vmax.f32 %v686_v45, 0.0 }
 0x17a   : > { %v598_v52 = vpop.f32.mrf.mxu1 }
 0x17b   : > { %v636_v53 = vmul.f32 %v1727_v33, %v598_v52  ;;  %v736_v56 = vmul.f32 %v1743_v44, %v719_v49  ;;  %v697_v57 = vadd.f32 %v1737_v36, %v679_v26  ;;  %v666_v26 = vmul.f32 %v1732_v38, %v1663_v1 }
 0x17d   : > { %v669_v58 = vadd.f32 %v653_v5, %v636_v53  ;;  %v1757_v19 = vadd.f32 %v736_v56, %v703_v20  ;;  %v730_v63 = vmin.f32 %v697_v57, 0.0  ;;  %v714_v12 = vmax.f32 %v697_v57, 0.0 }
 0x17e   : > { %v625_v60 = vpop.f32.mrf.mxu3  ;;  %v656_v57 = vmul.f32 %v1732_v38, %v1675_v16  ;;  %v657_v16 = vmul.f32 %v1732_v38, %v1689_v47 }
 0x17f   : > { %v647_v61 = vmul.f32 %v1727_v33, %v625_v60  ;;  %v769_v51 = vpack.c.bf16 %v1757_v19, %v1755_v59  ;;  %v687_v0 = vadd.f32 %v1737_v36, %v669_v58  ;;  %v747_v9 = vmul.f32 %v1743_v44, %v730_v63 }
 0x181   : > { %v680_v3 = vadd.f32 %v664_v27, %v647_v61  ;;  %785 = vmatmul.bf16.vlgmr.msra.gmra.mxu2 %v769_v51  ;;  %v720_v10 = vmin.f32 %v687_v0, 0.0  ;;  %v1775_v50 = vadd.f32 %v747_v9, %v714_v12  ;;  %v704_v62 = vmax.f32 %v687_v0, 0.0 }
 0x182   : > { %v600_v7 = vpop.f32.mrf.mxu1 }
 0x183   : > { %v698_v29 = vadd.f32 %v1737_v36, %v680_v3  ;;  %v637_v21 = vmul.f32 %v1727_v33, %v600_v7  ;;  %v737_v15 = vmul.f32 %v1743_v44, %v720_v10 }
 0x185   : > { %v731_v28 = vmin.f32 %v698_v29, 0.0  ;;  %v670_v11 = vadd.f32 %v654_v8, %v637_v21  ;;  %v715_v18 = vmax.f32 %v698_v29, 0.0  ;;  %v1787_v2 = vadd.f32 %v737_v15, %v704_v62 }
 0x186   : > { %v628_v13 = vpop.f32.mrf.mxu3 }
 0x187   : > { %v748_v25 = vmul.f32 %v1743_v44, %v731_v28  ;;  %v688_v23 = vadd.f32 %v1737_v36, %v670_v11  ;;  %v648_v32 = vmul.f32 %v1727_v33, %v628_v13 }
 0x189   : > { %v1777_v55 = vadd.f32 %v748_v25, %v715_v18  ;;  %v721_v34 = vmin.f32 %v688_v23, 0.0  ;;  %v681_v35 = vadd.f32 %v665_v14, %v648_v32  ;;  %v705_v42 = vmax.f32 %v688_v23, 0.0 }
 0x18a   : > { %v603_v37 = vpop.f32.mrf.mxu1 }
 0x18b   : > { %v638_v40 = vmul.f32 %v1727_v33, %v603_v37  ;;  %v775_v41 = vpack.c.bf16 %v1777_v55, %v1775_v50  ;;  %v738_v43 = vmul.f32 %v1743_v44, %v721_v34  ;;  %v699_v24 = vadd.f32 %v1737_v36, %v681_v35 }
 0x18c   : > { %v658_v34 = vmul.f32 %v1732_v38, %v1691_v48 }
 0x18d   : > { %v671_v45 = vadd.f32 %v655_v39, %v638_v40  ;;  %815 = vmatmul.bf16.vlgmr.msra.gmra.mxu3 %v775_v41  ;;  %v1789_v46 = vadd.f32 %v738_v43, %v705_v42  ;;  %v732_v52 = vmin.f32 %v699_v24, 0.0  ;;  %v716_v51 = vmax.f32 %v699_v24, 0.0 }
 0x18e   : > { %v630_v49 = vpop.f32.mrf.mxu3  ;;  %v659_v41 = vmul.f32 %v1732_v38, %v1705_v4 }
 0x18f   : > { %v649_v22 = vmul.f32 %v1727_v33, %v630_v49  ;;  %v770_v17 = vpack.c.bf16 %v1789_v46, %v1787_v2  ;;  %v689_v5 = vadd.f32 %v1737_v36, %v671_v45  ;;  %v749_v1 = vmul.f32 %v1743_v44, %v732_v52 }
 0x191   : > { %v682_v53 = vadd.f32 %v666_v26, %v649_v22  ;;  %790 = vmatmul.bf16.gmra.mxu2 %v770_v17  ;;  %v722_v58 = vmin.f32 %v689_v5, 0.0  ;;  %v1804_v7 = vadd.f32 %v749_v1, %v716_v51  ;;  %v706_v9 = vmax.f32 %v689_v5, 0.0 }
 0x192   : > { %v605_v54 = vpop.f32.mrf.mxu1  ;;  %v660_v5 = vmul.f32 %v1732_v38, %v1707_v6 }
 0x193   : > { %v700_v20 = vadd.f32 %v1737_v36, %v682_v53  ;;  %v639_v56 = vmul.f32 %v1727_v33, %v605_v54  ;;  %v739_v21 = vmul.f32 %v1743_v44, %v722_v58 }
 0x195   : > { %v733_v60 = vmin.f32 %v700_v20, 0.0  ;;  %v672_v61 = vadd.f32 %v656_v57, %v639_v56  ;;  %v717_v63 = vmax.f32 %v700_v20, 0.0  ;;  %v1815_v14 = vadd.f32 %v739_v21, %v706_v9 }
 0x197   : > { %v690_v27 = vadd.f32 %v1737_v36, %v672_v61  ;;  %v750_v0 = vmul.f32 %v1743_v44, %v733_v60  ;;  %v661_v60 = vmul.f32 %v1732_v38, %v1718_v31 }
 0x199   : > { %v723_v3 = vmin.f32 %v690_v27, 0.0  ;;  %v1806_v29 = vadd.f32 %v750_v0, %v717_v63  ;;  %v707_v11 = vmax.f32 %v690_v27, 0.0 }
 0x19a   : > { %v608_v8 = vpop.f32.mrf.mxu1 }
 0x19b   : > { %v640_v10 = vmul.f32 %v1727_v33, %v608_v8  ;;  %v776_v28 = vpack.c.bf16 %v1806_v29, %v1804_v7  ;;  %v740_v12 = vmul.f32 %v1743_v44, %v723_v3 }
 0x19d   : > { %v673_v13 = vadd.f32 %v657_v16, %v640_v10  ;;  %820 = vmatmul.bf16.gmra.mxu3 %v776_v28  ;;  %v1817_v18 = vadd.f32 %v740_v12, %v707_v11  ;;  %v662_v16 = vmul.f32 %v1732_v38, %v1720_v30  ;;  %v1869_v30 = vld [vmem:[%s1999_s3 + $0x2] ss:$0 sm:$0xff] }
 0x19e   : > { %v1874_v38 = vld [vmem:[%s1998_s2 + $0x2] ss:$0 sm:$0xff] }
 0x19f   : > { %v771_v25 = vpack.c.bf16 %v1817_v18, %v1815_v14  ;;  %v691_v47 = vadd.f32 %v1737_v36, %v673_v13 }
 0x1a1   : > { %795 = vmatmul.bf16.gmra.mxu2 %v771_v25  ;;  %v724_v35 = vmin.f32 %v691_v47, 0.0  ;;  %v708_v43 = vmax.f32 %v691_v47, 0.0 }
 0x1a2   : > { %v610_v23 = vpop.f32.mrf.mxu1 }
 0x1a3   : > { %v641_v32 = vmul.f32 %v1727_v33, %v610_v23  ;;  %v741_v62 = vmul.f32 %v1743_v44, %v724_v35  ;;  %v1879_v35 = vstv %s1068_s26 }
 0x1a5   : > { %v674_v15 = vadd.f32 %v658_v34, %v641_v32  ;;  %v1831_v22 = vadd.f32 %v741_v62, %v708_v43  ;;  %v844_v34 = vmul.f32 %v1874_v38, %v1755_v59 }
 0x1a7   : > { %v692_v37 = vadd.f32 %v1737_v36, %v674_v15 }
 0x1a9   : > { %v725_v39 = vmin.f32 %v692_v37, 0.0  ;;  %v709_v24 = vmax.f32 %v692_v37, 0.0 }
 0x1aa   : > { %v613_v40 = vpop.f32.mrf.mxu1 }
 0x1ab   : > { %v642_v42 = vmul.f32 %v1727_v33, %v613_v40  ;;  %v742_v45 = vmul.f32 %v1743_v44, %v725_v39  ;;  %v845_v40 = vmul.f32 %v1874_v38, %v1757_v19  ;;  %v846_v19 = vmul.f32 %v1874_v38, %v1787_v2 }
 0x1ac   : > { %v847_v2 = vmul.f32 %v1874_v38, %v1789_v46  ;;  %v848_v46 = vmul.f32 %v1874_v38, %v1815_v14  ;;  %v849_v14 = vmul.f32 %v1874_v38, %v1817_v18 }
 0x1ad   : > { %v675_v49 = vadd.f32 %v659_v41, %v642_v42  ;;  %v1833_v48 = vadd.f32 %v742_v45, %v709_v24  ;;  %v856_v24 = vmul.f32 %v1874_v38, %v1775_v50  ;;  %v857_v50 = vmul.f32 %v1874_v38, %v1777_v55 }
 0x1ae   : > { %v858_v55 = vmul.f32 %v1874_v38, %v1804_v7  ;;  %v859_v7 = vmul.f32 %v1874_v38, %v1806_v29 }
 0x1af   : > { %v772_v26 = vpack.c.bf16 %v1833_v48, %v1831_v22  ;;  %v693_v17 = vadd.f32 %v1737_v36, %v675_v49 }
 0x1b1   : > { %800 = vmatmul.bf16.gmra.mxu2 %v772_v26  ;;  %v726_v53 = vmin.f32 %v693_v17, 0.0  ;;  %v710_v1 = vmax.f32 %v693_v17, 0.0 }
 0x1b2   : > { %v615_v52 = vpop.f32.mrf.mxu1 }
 0x1b3   : > { %v643_v4 = vmul.f32 %v1727_v33, %v615_v52  ;;  %v743_v57 = vmul.f32 %v1743_v44, %v726_v53 }
 0x1b5   : > { %v676_v54 = vadd.f32 %v660_v5, %v643_v4  ;;  %v1847_v0 = vadd.f32 %v743_v57, %v710_v1 }
 0x1b7   : > { %v694_v20 = vadd.f32 %v1737_v36, %v676_v54 }
 0x1b9   : > { %v727_v56 = vmin.f32 %v694_v20, 0.0  ;;  %v711_v27 = vmax.f32 %v694_v20, 0.0 }
 0x1ba   : > { %v618_v58 = vpop.f32.mrf.mxu1 }
 0x1bb   : > { %v644_v61 = vmul.f32 %v1727_v33, %v618_v58  ;;  %v744_v51 = vmul.f32 %v1743_v44, %v727_v56 }
 0x1bd   : > { %v677_v63 = vadd.f32 %v661_v60, %v644_v61  ;;  %v1849_v6 = vadd.f32 %v744_v51, %v711_v27 }
 0x1bf   : > { %v773_v3 = vpack.c.bf16 %v1849_v6, %v1847_v0  ;;  %v695_v21 = vadd.f32 %v1737_v36, %v677_v63 }
 0x1c1   : > { %805 = vmatmul.bf16.gmra.mxu2 %v773_v3  ;;  %v728_v9 = vmin.f32 %v695_v21, 0.0  ;;  %v712_v13 = vmax.f32 %v695_v21, 0.0 }
 0x1c2   : > { %v620_v8 = vpop.f32.mrf.mxu1 }
 0x1c3   : > { %v645_v31 = vmul.f32 %v1727_v33, %v620_v8  ;;  %v745_v12 = vmul.f32 %v1743_v44, %v728_v9 }
 0x1c5   : > { %v678_v10 = vadd.f32 %v662_v16, %v645_v31  ;;  %v1860_v23 = vadd.f32 %v745_v12, %v712_v13 }
 0x1c7   : > { %v696_v28 = vadd.f32 %v1737_v36, %v678_v10 }
 0x1c9   : > { %v729_v11 = vmin.f32 %v696_v28, 0.0  ;;  %v713_v25 = vmax.f32 %v696_v28, 0.0 }
 0x1cb   : > { %v746_v47 = vmul.f32 %v1743_v44, %v729_v11 }
 0x1cd   : > { %v1862_v32 = vadd.f32 %v746_v47, %v713_v25  ;;  %v850_v47 = vmul.f32 %v1874_v38, %v1831_v22  ;;  %v852_v22 = vmul.f32 %v1874_v38, %v1847_v0  ;;  %v854_v0 = vmul.f32 %v1874_v38, %v1860_v23 }
 0x1cf   : > { %v774_v33 = vpack.c.bf16 %v1862_v32, %v1860_v23 }
 0x1d1   : > { %810 = vmatmul.bf16.gmra.mxu2 %v774_v33 }
 0x204   : > { %v786_v36 = vpop.f32.mrf.mxu2 }
 0x205   : > { %v827_v44 = vmul.f32 %v1869_v30, %v786_v36 }
 0x207   : > { %v860_v15 = vadd.f32 %v844_v34, %v827_v44  ;;  %v851_v34 = vmul.f32 %v1874_v38, %v1833_v48  ;;  %v853_v48 = vmul.f32 %v1874_v38, %v1849_v6 }
 0x209   : > { %v878_v37 = vadd.f32 %v1879_v35, %v860_v15 }
 0x20b   : > { %894 = vst [vmem:[%s1884_s5] sm:$0xff] %v878_v37 }
 0x20c   : > { %v788_v39 = vpop.f32.mrf.mxu2 }
 0x20d   : > { %v828_v62 = vmul.f32 %v1869_v30, %v788_v39 }
 0x20f   : > { %v861_v41 = vadd.f32 %v845_v40, %v828_v62 }
 0x210   : > { %v816_v59 = vpop.f32.mrf.mxu3 }
 0x211   : > { %v879_v42 = vadd.f32 %v1879_v35, %v861_v41  ;;  %v839_v43 = vmul.f32 %v1869_v30, %v816_v59 }
 0x213   : > { %895 = vst [vmem:[%s1884_s5 + $0x8] sm:$0xff] %v879_v42  ;;  %v872_v45 = vadd.f32 %v856_v24, %v839_v43 }
 0x214   : > { %v791_v49 = vpop.f32.mrf.mxu2 }
 0x215   : > { %v890_v26 = vadd.f32 %v1879_v35, %v872_v45  ;;  %v829_v17 = vmul.f32 %v1869_v30, %v791_v49 }
 0x217   : > { %906 = vst [vmem:[%s1884_s5 + $0x60] sm:$0xff] %v890_v26  ;;  %v862_v52 = vadd.f32 %v846_v19, %v829_v17 }
 0x218   : > { %v818_v4 = vpop.f32.mrf.mxu3 }
 0x219   : > { %v880_v5 = vadd.f32 %v1879_v35, %v862_v52  ;;  %v840_v53 = vmul.f32 %v1869_v30, %v818_v4  ;;  %v855_v52 = vmul.f32 %v1874_v38, %v1862_v32 }
 0x21b   : > { %896 = vst [vmem:[%s1884_s5 + $0x10] sm:$0xff] %v880_v5  ;;  %v873_v54 = vadd.f32 %v857_v50, %v840_v53 }
 0x21c   : > { %v793_v20 = vpop.f32.mrf.mxu2 }
 0x21d   : > { %v891_v56 = vadd.f32 %v1879_v35, %v873_v54  ;;  %v830_v57 = vmul.f32 %v1869_v30, %v793_v20 }
 0x21f   : > { %907 = vst [vmem:[%s1884_s5 + $0x68] sm:$0xff] %v891_v56  ;;  %v863_v58 = vadd.f32 %v847_v2, %v830_v57 }
 0x220   : > { %v821_v60 = vpop.f32.mrf.mxu3 }
 0x221   : > { %v881_v61 = vadd.f32 %v1879_v35, %v863_v58  ;;  %v841_v1 = vmul.f32 %v1869_v30, %v821_v60 }
 0x223   : > { %897 = vst [vmem:[%s1884_s5 + $0x18] sm:$0xff] %v881_v61  ;;  %v874_v27 = vadd.f32 %v858_v55, %v841_v1 }
 0x224   : > { %v796_v51 = vpop.f32.mrf.mxu2 }
 0x225   : > { %v892_v63 = vadd.f32 %v1879_v35, %v874_v27  ;;  %v831_v3 = vmul.f32 %v1869_v30, %v796_v51 }
 0x227   : > { %908 = vst [vmem:[%s1884_s5 + $0x70] sm:$0xff] %v892_v63  ;;  %v864_v21 = vadd.f32 %v848_v46, %v831_v3 }
 0x228   : > { %v823_v8 = vpop.f32.mrf.mxu3 }
 0x229   : > { %v882_v31 = vadd.f32 %v1879_v35, %v864_v21  ;;  %v842_v16 = vmul.f32 %v1869_v30, %v823_v8 }
 0x22b   : > { %898 = vst [vmem:[%s1884_s5 + $0x20] sm:$0xff] %v882_v31  ;;  %v875_v9 = vadd.f32 %v859_v7, %v842_v16 }
 0x22c   : > { %v798_v10 = vpop.f32.mrf.mxu2 }
 0x22d   : > { %v893_v28 = vadd.f32 %v1879_v35, %v875_v9  ;;  %v832_v11 = vmul.f32 %v1869_v30, %v798_v10 }
 0x22f   : > { %909 = vst [vmem:[%s1884_s5 + $0x78] sm:$0xff] %v893_v28  ;;  %v865_v12 = vadd.f32 %v849_v14, %v832_v11 }
 0x231   : > { %v883_v13 = vadd.f32 %v1879_v35, %v865_v12 }
 0x233   : > { %899 = vst [vmem:[%s1884_s5 + $0x28] sm:$0xff] %v883_v13 }
 0x234   : > { %v801_v25 = vpop.f32.mrf.mxu2 }
 0x235   : > { %v833_v29 = vmul.f32 %v1869_v30, %v801_v25 }
 0x237   : > { %v866_v33 = vadd.f32 %v850_v47, %v833_v29 }
 0x239   : > { %v884_v36 = vadd.f32 %v1879_v35, %v866_v33 }
 0x23b   : > { %900 = vst [vmem:[%s1884_s5 + $0x30] sm:$0xff] %v884_v36 }
 0x23c   : > { %v803_v44 = vpop.f32.mrf.mxu2 }
 0x23d   : > { %v834_v18 = vmul.f32 %v1869_v30, %v803_v44 }
 0x23f   : > { %v867_v15 = vadd.f32 %v851_v34, %v834_v18 }
 0x241   : > { %v885_v37 = vadd.f32 %v1879_v35, %v867_v15 }
 0x243   : > { %901 = vst [vmem:[%s1884_s5 + $0x38] sm:$0xff] %v885_v37 }
 0x244   : > { %v806_v39 = vpop.f32.mrf.mxu2 }
 0x245   : > { %v835_v62 = vmul.f32 %v1869_v30, %v806_v39 }
 0x247   : > { %v868_v40 = vadd.f32 %v852_v22, %v835_v62 }
 0x249   : > { %v886_v41 = vadd.f32 %v1879_v35, %v868_v40 }
 0x24b   : > { %902 = vst [vmem:[%s1884_s5 + $0x40] sm:$0xff] %v886_v41 }
 0x24c   : > { %v808_v59 = vpop.f32.mrf.mxu2 }
 0x24d   : > { %v836_v42 = vmul.f32 %v1869_v30, %v808_v59 }
 0x24f   : > { %v869_v43 = vadd.f32 %v853_v48, %v836_v42 }
 0x251   : > { %v887_v24 = vadd.f32 %v1879_v35, %v869_v43 }
 0x253   : > { %903 = vst [vmem:[%s1884_s5 + $0x48] sm:$0xff] %v887_v24 }
 0x254   : > { %v811_v45 = vpop.f32.mrf.mxu2 }
 0x255   : > { %v837_v49 = vmul.f32 %v1869_v30, %v811_v45 }
 0x257   : > { %v870_v26 = vadd.f32 %v854_v0, %v837_v49 }
 0x259   : > { %v888_v17 = vadd.f32 %v1879_v35, %v870_v26 }
 0x25b   : > { %904 = vst [vmem:[%s1884_s5 + $0x50] sm:$0xff] %v888_v17 }
 0x25c   : > { %v813_v6 = vpop.f32.mrf.mxu2 }
 0x25d   : > { %v838_v19 = vmul.f32 %v1869_v30, %v813_v6 }
 0x25f   : > { %v871_v23 = vadd.f32 %v855_v52, %v838_v19 }
 0x261   : > { %v889_v4 = vadd.f32 %v1879_v35, %v871_v23 }
 0x263   : > { %905 = vst [vmem:[%s1884_s5 + $0x58] sm:$0xff] %v889_v4 }
 0x264   : > { %1272 = shalt.err (!%p1269_p8)
}
 0x265   : > { %s1325_s28 = smov 128   ;;  %s1326_s29 = smov 8  }
 0x266   : > { %1118 = dma.vmem_to_hbm [thread:$0]  (%p1414_p11), %s924_s13, 2048, %s926_s12, %s911_s25, %s1325_s28, %s1325_s28, %s1326_s29  }
 0x267 PF: > { %s940_s4 = sand.u32 1, %s1307_s21   ;;  %p2017_p9 = scmp.ge.s32.totalorder %s1319_s24, 2 }
 0x268   : > { %s941_s20 = scalar_lea.sflag [#allocation4], %s940_s4 }
 0x269   : > { %p1132_p10 = pnand %p2017_p9, %p1418_p12 }
 0x26b   : > { %p1133_p1 = pneg %p1132_p10 }
 0x26d   : > { %1302 = dma.done.wait (%p1133_p1), %s941_s20, 2048  }
 0x26e   : > { %1304 = vsyncadd (%p1133_p1), %s941_s20, 4294965248  ;;  %s2018_s24 = sld [smem:[#allocation14_spill]]  ;;  %s2020_s21 = smov %s1311_s22 }
 0x26f   : > { %s2019_s27 = sld [smem:[#allocation15_spill]]  ;;  %s2021_s22 = smov %s1315_s23 }
 0x274   : > { %p21_p2 = scmp.ge.s32.totalorder %s2018_s24, 4  }
 0x275   : > { %s2022_s23 = smov %s2019_s27 }
 0x276   :  { %23 = sbr.rel (!%p21_p2) target bundleno = 10 (0xa), region = 98 }
 0x27b   :  { %947 = vsyncpa [#allocation3], 1 }
 0x27c   :  { %949 = vsyncpa [#allocation3 + $0x1], 1 }
 0x27d   :  { %950 = vsyncpa [#allocation4], 1 }
 0x27e   :  { %952 = vsyncpa [#allocation4 + $0x1], 1 }
 0x27f   :  { %953 = vsyncpa [#allocation5], 1 }
 0x280   :  { %955 = vsyncpa [#allocation5 + $0x1], 1 }
 0x281   :  { %956 = vsyncpa [#allocation8], 1 }

</bundles_post_ra>
